<compile_context>
chip_gen: v6e
topology: v6e:2x2x1
jax: 0.10.0
libtpu: 0.0.40
codegen_flags: <defaults>
</compile_context>

<pallas_src>
import functools

import jax
import jax.numpy as jnp
from jax.experimental import pallas as pl
from jax.experimental.pallas import tpu as pltpu


def _round_up(v, m):
    return ((v + m - 1) // m) * m


def het_emb_layer_kernel(x_ref, hsrc_ref, scat_ref, wmsg_ref, bmsg_ref,
                         wself_ref, bself_ref, gamma_ref, beta_ref,
                         o_ref, acc_ref, *, h_true):
    k = pl.program_id(1)

    @pl.when(k == 0)
    def _init():
        acc_ref[...] = jnp.zeros_like(acc_ref)

    # Edge messages for this E-tile: (tE, HP); bf16 MXU matmul, f32 result.
    msg = jnp.dot(hsrc_ref[...], wmsg_ref[...],
                  preferred_element_type=jnp.float32) + bmsg_ref[...]
    # Sum-aggregate onto this node tile via the dense 0/1 scatter matmul.
    acc_ref[...] += jnp.dot(scat_ref[...], msg.astype(jnp.bfloat16),
                            preferred_element_type=jnp.float32)

    @pl.when(k == pl.num_programs(1) - 1)
    def _epilogue():
        # Self transform + aggregated messages (hoisted out of the E loop).
        h = (jnp.dot(x_ref[...], wself_ref[...],
                     preferred_element_type=jnp.float32)
             + bself_ref[...] + acc_ref[...])
        # dropout -> identity (eval mode).
        # LayerNorm over the TRUE hidden width; padded lanes of h are exactly
        # zero so plain full-lane sums are correct with a 1/H_true scale.
        inv_h = 1.0 / h_true
        mean = jnp.sum(h, axis=-1, keepdims=True) * inv_h
        var = jnp.sum(h * h, axis=-1, keepdims=True) * inv_h - mean * mean
        hn = (h - mean) * jax.lax.rsqrt(var + 1e-5)
        hn = hn * gamma_ref[...] + beta_ref[...]   # gamma/beta zero in pad lanes
        o_ref[...] = jnp.maximum(hn, 0.0).astype(o_ref.dtype)


def het_emb_layer(x_bf, h_src_bf, scatter_bf, layer, *, h_true, tn, te):
    NP, HP = x_bf.shape
    EP = h_src_bf.shape[0]
    grid = (NP // tn, EP // te)
    kernel = functools.partial(het_emb_layer_kernel, h_true=float(h_true))
    return pl.pallas_call(
        kernel,
        out_shape=jax.ShapeDtypeStruct((NP, HP), jnp.float32),
        grid_spec=pltpu.PrefetchScalarGridSpec(
            num_scalar_prefetch=0,
            grid=grid,
            in_specs=[
                pl.BlockSpec((tn, HP), lambda i, k: (i, 0)),   # x
                pl.BlockSpec((te, HP), lambda i, k: (k, 0)),   # h_src (edge msgs in)
                pl.BlockSpec((tn, te), lambda i, k: (i, k)),   # scatter
                pl.BlockSpec((HP, HP), lambda i, k: (0, 0)),   # w_msg
                pl.BlockSpec((1, HP), lambda i, k: (0, 0)),    # b_msg
                pl.BlockSpec((HP, HP), lambda i, k: (0, 0)),   # w_self
                pl.BlockSpec((1, HP), lambda i, k: (0, 0)),    # b_self
                pl.BlockSpec((1, HP), lambda i, k: (0, 0)),    # gamma
                pl.BlockSpec((1, HP), lambda i, k: (0, 0)),    # beta
            ],
            out_specs=pl.BlockSpec((tn, HP), lambda i, k: (i, 0)),
            scratch_shapes=[pltpu.VMEM((tn, HP), jnp.float32)],
        ),
        compiler_params=pltpu.CompilerParams(
            dimension_semantics=("parallel", "arbitrary")),
    )(x_bf, h_src_bf, scatter_bf,
      layer["w_msg"], layer["b_msg"],
      layer["w_self"], layer["b_self"],
      layer["gamma"], layer["beta"])


def init_gnn_params(key, n_hid, n_layers, num_node_type, num_edge_type):
    layers = []
    for _ in range(n_layers):
        key, *ks = jax.random.split(key, 7)
        s = 1.0 / jnp.sqrt(n_hid)
        layers.append({
            "node_emb": jax.random.normal(ks[0], (num_node_type, n_hid), jnp.float32) * 0.02,
            "edge_emb": jax.random.normal(ks[1], (num_edge_type, n_hid), jnp.float32) * 0.02,
            "w_msg":  jax.random.uniform(ks[2], (n_hid, n_hid), jnp.float32, -s, s),
            "b_msg":  jax.random.uniform(ks[3], (1, n_hid), jnp.float32, -s, s),
            "w_self": jax.random.uniform(ks[4], (n_hid, n_hid), jnp.float32, -s, s),
            "b_self": jax.random.uniform(ks[5], (1, n_hid), jnp.float32, -s, s),
            "gamma":  jnp.ones((1, n_hid), jnp.float32),
            "beta":   jnp.zeros((1, n_hid), jnp.float32),
        })
    return {"layers": layers}


def _pad_layer(layer, H, HP):
    p = HP - H
    pad_mat = lambda w: jnp.pad(w, ((0, p), (0, p))).astype(jnp.bfloat16)
    pad_row = lambda v: jnp.pad(v, ((0, 0), (0, p)))
    return {
        "w_msg":    pad_mat(layer["w_msg"]),
        "b_msg":    pad_row(layer["b_msg"]),
        "w_self":   pad_mat(layer["w_self"]),
        "b_self":   pad_row(layer["b_self"]),
        "gamma":    pad_row(layer["gamma"]),   # zeros in padded lanes
        "beta":     pad_row(layer["beta"]),
        "node_emb": jnp.pad(layer["node_emb"], ((0, 0), (0, p))),
        "edge_emb": jnp.pad(layer["edge_emb"], ((0, 0), (0, p))),
    }


@jax.jit
def gnn_forward(params, x, edge_index, node_type, edge_type):
    """Mirrors GNN.forward: single edge_index reused for all layers."""
    src, dst = edge_index[0], edge_index[1]
    N, H = x.shape
    E = src.shape[0]

    # Lane-dense padding of the hidden dim; modest tiles fit every generation
    # (v7x 64 MiB VMEM included) with double-buffering headroom.
    HP = _round_up(H, 128)
    tn = min(256, _round_up(N, 8))
    te = min(512, _round_up(E, 128))
    NP = _round_up(N, tn)
    EP = _round_up(E, te)

    # Dense 0/1 scatter matrix in bf16 (exact for 0/1), built once, reused
    # unchanged across all layers.
    # TODO(synk): for large sparse graphs replace the dense (N,E) scatter
    # matmul with a CSR segment-sum driven by PrefetchScalarGridSpec offsets.
    scatter = jnp.zeros((NP, EP), jnp.float32).at[dst, jnp.arange(E)].add(1.0)
    scatter = scatter.astype(jnp.bfloat16)

    x = jnp.pad(x, ((0, NP - N), (0, HP - H)))   # f32, padded lanes/rows = 0

    for layer in params["layers"]:
        lp = _pad_layer(layer, H, HP)
        # Gather source features + heterogeneous embeddings (glue).
        # TODO(synk): fuse this gather into the kernel with scalar-prefetched
        # src indices to avoid the (E,HP) HBM round trip per layer.
        h_src = (x[src]
                 + lp["node_emb"][node_type[src]]
                 + lp["edge_emb"][edge_type])
        h_src = jnp.pad(h_src, ((0, EP - E), (0, 0))).astype(jnp.bfloat16)
        x = het_emb_layer(x.astype(jnp.bfloat16), h_src, scatter, lp,
                          h_true=H, tn=tn, te=te)
    return x[:N, :H]


if __name__ == "__main__":
    # small shapes: N nodes, E edges, hidden width H
    N, E, H = 16, 32, 32
    n_layers, n_heads = 2, 2      # n_heads unused in simplified het-emb conv
    num_node_type, num_edge_type = 3, 4

    key = jax.random.PRNGKey(0)
    k_x, k_ei, k_nt, k_et, k_p = jax.random.split(key, 5)

    x = jax.random.normal(k_x, (N, H), jnp.float32)
    edge_index = jax.random.randint(k_ei, (2, E), 0, N, jnp.int32)
    node_type = jax.random.randint(k_nt, (N,), 0, num_node_type, jnp.int32)
    edge_type = jax.random.randint(k_et, (E,), 0, num_edge_type, jnp.int32)

    params = init_gnn_params(k_p, H, n_layers, num_node_type, num_edge_type)

    out = gnn_forward(params, x, edge_index, node_type, edge_type)
    out = jax.block_until_ready(out)
    assert out.shape == (N, H)
    assert bool(jnp.all(jnp.isfinite(out)))
    assert bool(jnp.all(out >= 0.0))  # ReLU output
    print("KERNEL_OK")
</pallas_src>

<mosaic_0001>
module attributes {stable_mosaic.version = 11 : i64} {
  func.func private @main(%arg0: i32) attributes {dimension_semantics = [#tpu.dimension_semantics<core_parallel>], iteration_bounds = array<i64: 2>, tpu.core_type = #tpu.core_type<sc_scalar_subcore>, window_params = []} {
    return
  }
}

module attributes {stable_mosaic.version = 11 : i64} {
  func.func private @main(%arg0: i32) attributes {dimension_semantics = [#tpu.dimension_semantics<core_parallel>], iteration_bounds = array<i64: 2>, tpu.core_type = #tpu.core_type<sc_scalar_subcore>, window_params = []} {
    return
  }
}

module attributes {stable_mosaic.version = 11 : i64} {
  func.func @het_emb_layer_kernel(%arg0: i32, %arg1: i32, %arg2: memref<16x128xbf16, #tpu.memory_space<vmem>>, %arg3: memref<128x128xbf16, #tpu.memory_space<vmem>>, %arg4: memref<16x128xbf16, #tpu.memory_space<vmem>>, %arg5: memref<128x128xbf16, #tpu.memory_space<vmem>>, %arg6: memref<1x128xf32, #tpu.memory_space<vmem>>, %arg7: memref<128x128xbf16, #tpu.memory_space<vmem>>, %arg8: memref<1x128xf32, #tpu.memory_space<vmem>>, %arg9: memref<1x128xf32, #tpu.memory_space<vmem>>, %arg10: memref<1x128xf32, #tpu.memory_space<vmem>>, %arg11: memref<16x128xf32, #tpu.memory_space<vmem>>, %arg12: memref<16x128xf32, #tpu.memory_space<vmem>>) attributes {dimension_semantics = [#tpu.dimension_semantics<parallel>, #tpu.dimension_semantics<arbitrary>], iteration_bounds = array<i64: 1, 1>, scalar_prefetch = 0 : i64, scratch_operands = 1 : i64, tpu.core_type = #tpu.core_type<tc>, window_params = [{transform_indices = @transform_0, window_bounds = array<i64: 16, 128>}, {transform_indices = @transform_1, window_bounds = array<i64: 128, 128>}, {transform_indices = @transform_2, window_bounds = array<i64: 16, 128>}, {pipeline_mode = #tpu.pipeline_mode<synchronous>, transform_indices = @transform_3, window_bounds = array<i64: 128, 128>}, {pipeline_mode = #tpu.pipeline_mode<synchronous>, transform_indices = @transform_4, window_bounds = array<i64: 1, 128>}, {pipeline_mode = #tpu.pipeline_mode<synchronous>, transform_indices = @transform_5, window_bounds = array<i64: 128, 128>}, {pipeline_mode = #tpu.pipeline_mode<synchronous>, transform_indices = @transform_6, window_bounds = array<i64: 1, 128>}, {pipeline_mode = #tpu.pipeline_mode<synchronous>, transform_indices = @transform_7, window_bounds = array<i64: 1, 128>}, {pipeline_mode = #tpu.pipeline_mode<synchronous>, transform_indices = @transform_8, window_bounds = array<i64: 1, 128>}, {transform_indices = @transform_9, window_bounds = array<i64: 16, 128>}]} {
    %c0_i32 = arith.constant 0 : i32
    %0 = arith.cmpi eq, %arg1, %c0_i32 : i32
    %1 = arith.extui %0 : i1 to i32
    %c0_i32_0 = arith.constant 0 : i32
    %2 = arith.cmpi ne, %1, %c0_i32_0 : i32
    scf.if %2 {
      %cst_15 = arith.constant 0.000000e+00 : f32
      %18 = vector.broadcast %cst_15 : f32 to vector<16x128xf32>
      %c0_16 = arith.constant 0 : index
      %c0_17 = arith.constant 0 : index
      %19 = vector.load %arg12[%c0_16, %c0_17] : memref<16x128xf32, #tpu.memory_space<vmem>>, vector<16x128xf32>
      tpu.vector_store %arg12[%c0_16, %c0_17], %18 {strides = array<i32>} : memref<16x128xf32, #tpu.memory_space<vmem>>, vector<16x128xf32>,
    } else {
    }
    %c0 = arith.constant 0 : index
    %c0_1 = arith.constant 0 : index
    %3 = vector.load %arg3[%c0, %c0_1] : memref<128x128xbf16, #tpu.memory_space<vmem>>, vector<128x128xbf16>
    %c0_2 = arith.constant 0 : index
    %c0_3 = arith.constant 0 : index
    %4 = vector.load %arg5[%c0_2, %c0_3] : memref<128x128xbf16, #tpu.memory_space<vmem>>, vector<128x128xbf16>
    %cst = arith.constant dense<0.000000e+00> : vector<128x128xf32>
    %5 = tpu.matmul %3, %4, %cst {dimension_numbers = #tpu.dot_dimension_numbers<[1], [0], [0], [1], [0, 0, 1, 1], [], []>} : vector<128x128xbf16>, vector<128x128xbf16>, vector<128x128xf32> -> vector<128x128xf32>
    %c0_4 = arith.constant 0 : index
    %c0_5 = arith.constant 0 : index
    %6 = vector.load %arg6[%c0_4, %c0_5] : memref<1x128xf32, #tpu.memory_space<vmem>>, vector<1x128xf32>
    %7 = vector.broadcast %6 : vector<1x128xf32> to vector<128x128xf32>
    %8 = arith.addf %5, %7 : vector<128x128xf32>
    %c0_6 = arith.constant 0 : index
    %c0_7 = arith.constant 0 : index
    %9 = vector.load %arg12[%c0_6, %c0_7] : memref<16x128xf32, #tpu.memory_space<vmem>>, vector<16x128xf32>
    %c0_8 = arith.constant 0 : index
    %c0_9 = arith.constant 0 : index
    %10 = vector.load %arg4[%c0_8, %c0_9] : memref<16x128xbf16, #tpu.memory_space<vmem>>, vector<16x128xbf16>
    %11 = arith.truncf %8 : vector<128x128xf32> to vector<128x128xbf16>
    %cst_10 = arith.constant dense<0.000000e+00> : vector<16x128xf32>
    %12 = tpu.matmul %10, %11, %cst_10 {dimension_numbers = #tpu.dot_dimension_numbers<[1], [0], [0], [1], [0, 0, 1, 1], [], []>} : vector<16x128xbf16>, vector<128x128xbf16>, vector<16x128xf32> -> vector<16x128xf32>
    %13 = arith.addf %9, %12 : vector<16x128xf32>
    %c0_11 = arith.constant 0 : index
    %c0_12 = arith.constant 0 : index
    %14 = vector.load %arg12[%c0_11, %c0_12] : memref<16x128xf32, #tpu.memory_space<vmem>>, vector<16x128xf32>
    tpu.vector_store %arg12[%c0_11, %c0_12], %13 {strides = array<i32>} : memref<16x128xf32, #tpu.memory_space<vmem>>, vector<16x128xf32>,
    %c0_i32_13 = arith.constant 0 : i32
    %15 = arith.cmpi eq, %arg1, %c0_i32_13 : i32
    %16 = arith.extui %15 : i1 to i32
    %c0_i32_14 = arith.constant 0 : i32
    %17 = arith.cmpi ne, %16, %c0_i32_14 : i32
    scf.if %17 {
      %c0_15 = arith.constant 0 : index
      %c0_16 = arith.constant 0 : index
      %18 = vector.load %arg2[%c0_15, %c0_16] : memref<16x128xbf16, #tpu.memory_space<vmem>>, vector<16x128xbf16>
      %c0_17 = arith.constant 0 : index
      %c0_18 = arith.constant 0 : index
      %19 = vector.load %arg7[%c0_17, %c0_18] : memref<128x128xbf16, #tpu.memory_space<vmem>>, vector<128x128xbf16>
      %cst_19 = arith.constant dense<0.000000e+00> : vector<16x128xf32>
      %20 = tpu.matmul %18, %19, %cst_19 {dimension_numbers = #tpu.dot_dimension_numbers<[1], [0], [0], [1], [0, 0, 1, 1], [], []>} : vector<16x128xbf16>, vector<128x128xbf16>, vector<16x128xf32> -> vector<16x128xf32>
      %c0_20 = arith.constant 0 : index
      %c0_21 = arith.constant 0 : index
      %21 = vector.load %arg8[%c0_20, %c0_21] : memref<1x128xf32, #tpu.memory_space<vmem>>, vector<1x128xf32>
      %22 = vector.broadcast %21 : vector<1x128xf32> to vector<16x128xf32>
      %23 = arith.addf %20, %22 : vector<16x128xf32>
      %c0_22 = arith.constant 0 : index
      %c0_23 = arith.constant 0 : index
      %24 = vector.load %arg12[%c0_22, %c0_23] : memref<16x128xf32, #tpu.memory_space<vmem>>, vector<16x128xf32>
      %25 = arith.addf %23, %24 : vector<16x128xf32>
      %cst_24 = arith.constant dense<0.000000e+00> : vector<16xf32>
      %26 = vector.multi_reduction <add>, %25, %cst_24 [1] : vector<16x128xf32> to vector<16xf32>
      %27 = vector.shape_cast %26 : vector<16xf32> to vector<16x1xf32>
      %cst_25 = arith.constant 3.125000e-02 : f32
      %28 = vector.broadcast %cst_25 : f32 to vector<16x1xf32>
      %29 = arith.mulf %27, %28 : vector<16x1xf32>
      %30 = arith.mulf %25, %25 : vector<16x128xf32>
      %cst_26 = arith.constant dense<0.000000e+00> : vector<16xf32>
      %31 = vector.multi_reduction <add>, %30, %cst_26 [1] : vector<16x128xf32> to vector<16xf32>
      %32 = vector.shape_cast %31 : vector<16xf32> to vector<16x1xf32>
      %cst_27 = arith.constant 3.125000e-02 : f32
      %33 = vector.broadcast %cst_27 : f32 to vector<16x1xf32>
      %34 = arith.mulf %32, %33 : vector<16x1xf32>
      %35 = arith.mulf %29, %29 : vector<16x1xf32>
      %36 = arith.subf %34, %35 : vector<16x1xf32>
      %37 = vector.broadcast %29 : vector<16x1xf32> to vector<16x128xf32>
      %38 = arith.subf %25, %37 : vector<16x128xf32>
      %cst_28 = arith.constant 9.99999974E-6 : f32
      %39 = vector.broadcast %cst_28 : f32 to vector<16x1xf32>
      %40 = arith.addf %36, %39 : vector<16x1xf32>
      %41 = math.rsqrt %40 : vector<16x1xf32>
      %42 = vector.broadcast %41 : vector<16x1xf32> to vector<16x128xf32>
      %43 = arith.mulf %38, %42 : vector<16x128xf32>
      %c0_29 = arith.constant 0 : index
      %c0_30 = arith.constant 0 : index
      %44 = vector.load %arg9[%c0_29, %c0_30] : memref<1x128xf32, #tpu.memory_space<vmem>>, vector<1x128xf32>
      %45 = vector.broadcast %44 : vector<1x128xf32> to vector<16x128xf32>
      %46 = arith.mulf %43, %45 : vector<16x128xf32>
      %c0_31 = arith.constant 0 : index
      %c0_32 = arith.constant 0 : index
      %47 = vector.load %arg10[%c0_31, %c0_32] : memref<1x128xf32, #tpu.memory_space<vmem>>, vector<1x128xf32>
      %48 = vector.broadcast %47 : vector<1x128xf32> to vector<16x128xf32>
      %49 = arith.addf %46, %48 : vector<16x128xf32>
      %cst_33 = arith.constant 0.000000e+00 : f32
      %50 = vector.broadcast %cst_33 : f32 to vector<16x128xf32>
      %51 = arith.maximumf %49, %50 : vector<16x128xf32>
      %c0_34 = arith.constant 0 : index
      %c0_35 = arith.constant 0 : index
      %52 = vector.load %arg11[%c0_34, %c0_35] : memref<16x128xf32, #tpu.memory_space<vmem>>, vector<16x128xf32>
      tpu.vector_store %arg11[%c0_34, %c0_35], %51 {strides = array<i32>} : memref<16x128xf32, #tpu.memory_space<vmem>>, vector<16x128xf32>,
    } else {
    }
    return
  }
  func.func @transform_0(%arg0: i32, %arg1: i32) -> (i32, i32) {
    %c0_i32 = arith.constant 0 : i32
    %c0_i32_0 = arith.constant 0 : i32
    return %arg0, %c0_i32 : i32, i32
  }
  func.func @transform_1(%arg0: i32, %arg1: i32) -> (i32, i32) {
    %c0_i32 = arith.constant 0 : i32
    %c0_i32_0 = arith.constant 0 : i32
    return %arg1, %c0_i32 : i32, i32
  }
  func.func @transform_2(%arg0: i32, %arg1: i32) -> (i32, i32) {
    %c0_i32 = arith.constant 0 : i32
    return %arg0, %arg1 : i32, i32
  }
  func.func @transform_3(%arg0: i32, %arg1: i32) -> (i32, i32) {
    %c0_i32 = arith.constant 0 : i32
    %c0_i32_0 = arith.constant 0 : i32
    %c0_i32_1 = arith.constant 0 : i32
    return %c0_i32, %c0_i32_0 : i32, i32
  }
  func.func @transform_4(%arg0: i32, %arg1: i32) -> (i32, i32) {
    %c0_i32 = arith.constant 0 : i32
    %c0_i32_0 = arith.constant 0 : i32
    %c0_i32_1 = arith.constant 0 : i32
    return %c0_i32, %c0_i32_0 : i32, i32
  }
  func.func @transform_5(%arg0: i32, %arg1: i32) -> (i32, i32) {
    %c0_i32 = arith.constant 0 : i32
    %c0_i32_0 = arith.constant 0 : i32
    %c0_i32_1 = arith.constant 0 : i32
    return %c0_i32, %c0_i32_0 : i32, i32
  }
  func.func @transform_6(%arg0: i32, %arg1: i32) -> (i32, i32) {
    %c0_i32 = arith.constant 0 : i32
    %c0_i32_0 = arith.constant 0 : i32
    %c0_i32_1 = arith.constant 0 : i32
    return %c0_i32, %c0_i32_0 : i32, i32
  }
  func.func @transform_7(%arg0: i32, %arg1: i32) -> (i32, i32) {
    %c0_i32 = arith.constant 0 : i32
    %c0_i32_0 = arith.constant 0 : i32
    %c0_i32_1 = arith.constant 0 : i32
    return %c0_i32, %c0_i32_0 : i32, i32
  }
  func.func @transform_8(%arg0: i32, %arg1: i32) -> (i32, i32) {
    %c0_i32 = arith.constant 0 : i32
    %c0_i32_0 = arith.constant 0 : i32
    %c0_i32_1 = arith.constant 0 : i32
    return %c0_i32, %c0_i32_0 : i32, i32
  }
  func.func @transform_9(%arg0: i32, %arg1: i32) -> (i32, i32) {
    %c0_i32 = arith.constant 0 : i32
    %c0_i32_0 = arith.constant 0 : i32
    return %arg0, %c0_i32 : i32, i32
  }
}

module attributes {stable_mosaic.version = 11 : i64} {
  func.func @het_emb_layer_kernel(%arg0: i32, %arg1: i32, %arg2: memref<16x128xbf16, #tpu.memory_space<vmem>>, %arg3: memref<128x128xbf16, #tpu.memory_space<vmem>>, %arg4: memref<16x128xbf16, #tpu.memory_space<vmem>>, %arg5: memref<128x128xbf16, #tpu.memory_space<vmem>>, %arg6: memref<1x128xf32, #tpu.memory_space<vmem>>, %arg7: memref<128x128xbf16, #tpu.memory_space<vmem>>, %arg8: memref<1x128xf32, #tpu.memory_space<vmem>>, %arg9: memref<1x128xf32, #tpu.memory_space<vmem>>, %arg10: memref<1x128xf32, #tpu.memory_space<vmem>>, %arg11: memref<16x128xf32, #tpu.memory_space<vmem>>, %arg12: memref<16x128xf32, #tpu.memory_space<vmem>>) attributes {dimension_semantics = [#tpu.dimension_semantics<parallel>, #tpu.dimension_semantics<arbitrary>], iteration_bounds = array<i64: 1, 1>, scalar_prefetch = 0 : i64, scratch_operands = 1 : i64, tpu.core_type = #tpu.core_type<tc>, window_params = [{transform_indices = @transform_0, window_bounds = array<i64: 16, 128>}, {transform_indices = @transform_1, window_bounds = array<i64: 128, 128>}, {transform_indices = @transform_2, window_bounds = array<i64: 16, 128>}, {pipeline_mode = #tpu.pipeline_mode<synchronous>, transform_indices = @transform_3, window_bounds = array<i64: 128, 128>}, {pipeline_mode = #tpu.pipeline_mode<synchronous>, transform_indices = @transform_4, window_bounds = array<i64: 1, 128>}, {pipeline_mode = #tpu.pipeline_mode<synchronous>, transform_indices = @transform_5, window_bounds = array<i64: 128, 128>}, {pipeline_mode = #tpu.pipeline_mode<synchronous>, transform_indices = @transform_6, window_bounds = array<i64: 1, 128>}, {pipeline_mode = #tpu.pipeline_mode<synchronous>, transform_indices = @transform_7, window_bounds = array<i64: 1, 128>}, {pipeline_mode = #tpu.pipeline_mode<synchronous>, transform_indices = @transform_8, window_bounds = array<i64: 1, 128>}, {transform_indices = @transform_9, window_bounds = array<i64: 16, 128>}]} {
    %c0_i32 = arith.constant 0 : i32
    %0 = arith.cmpi eq, %arg1, %c0_i32 : i32
    %1 = arith.extui %0 : i1 to i32
    %c0_i32_0 = arith.constant 0 : i32
    %2 = arith.cmpi ne, %1, %c0_i32_0 : i32
    scf.if %2 {
      %cst_15 = arith.constant 0.000000e+00 : f32
      %18 = vector.broadcast %cst_15 : f32 to vector<16x128xf32>
      %c0_16 = arith.constant 0 : index
      %c0_17 = arith.constant 0 : index
      %19 = vector.load %arg12[%c0_16, %c0_17] : memref<16x128xf32, #tpu.memory_space<vmem>>, vector<16x128xf32>
      tpu.vector_store %arg12[%c0_16, %c0_17], %18 {strides = array<i32>} : memref<16x128xf32, #tpu.memory_space<vmem>>, vector<16x128xf32>,
    } else {
    }
    %c0 = arith.constant 0 : index
    %c0_1 = arith.constant 0 : index
    %3 = vector.load %arg3[%c0, %c0_1] : memref<128x128xbf16, #tpu.memory_space<vmem>>, vector<128x128xbf16>
    %c0_2 = arith.constant 0 : index
    %c0_3 = arith.constant 0 : index
    %4 = vector.load %arg5[%c0_2, %c0_3] : memref<128x128xbf16, #tpu.memory_space<vmem>>, vector<128x128xbf16>
    %cst = arith.constant dense<0.000000e+00> : vector<128x128xf32>
    %5 = tpu.matmul %3, %4, %cst {dimension_numbers = #tpu.dot_dimension_numbers<[1], [0], [0], [1], [0, 0, 1, 1], [], []>} : vector<128x128xbf16>, vector<128x128xbf16>, vector<128x128xf32> -> vector<128x128xf32>
    %c0_4 = arith.constant 0 : index
    %c0_5 = arith.constant 0 : index
    %6 = vector.load %arg6[%c0_4, %c0_5] : memref<1x128xf32, #tpu.memory_space<vmem>>, vector<1x128xf32>
    %7 = vector.broadcast %6 : vector<1x128xf32> to vector<128x128xf32>
    %8 = arith.addf %5, %7 : vector<128x128xf32>
    %c0_6 = arith.constant 0 : index
    %c0_7 = arith.constant 0 : index
    %9 = vector.load %arg12[%c0_6, %c0_7] : memref<16x128xf32, #tpu.memory_space<vmem>>, vector<16x128xf32>
    %c0_8 = arith.constant 0 : index
    %c0_9 = arith.constant 0 : index
    %10 = vector.load %arg4[%c0_8, %c0_9] : memref<16x128xbf16, #tpu.memory_space<vmem>>, vector<16x128xbf16>
    %11 = arith.truncf %8 : vector<128x128xf32> to vector<128x128xbf16>
    %cst_10 = arith.constant dense<0.000000e+00> : vector<16x128xf32>
    %12 = tpu.matmul %10, %11, %cst_10 {dimension_numbers = #tpu.dot_dimension_numbers<[1], [0], [0], [1], [0, 0, 1, 1], [], []>} : vector<16x128xbf16>, vector<128x128xbf16>, vector<16x128xf32> -> vector<16x128xf32>
    %13 = arith.addf %9, %12 : vector<16x128xf32>
    %c0_11 = arith.constant 0 : index
    %c0_12 = arith.constant 0 : index
    %14 = vector.load %arg12[%c0_11, %c0_12] : memref<16x128xf32, #tpu.memory_space<vmem>>, vector<16x128xf32>
    tpu.vector_store %arg12[%c0_11, %c0_12], %13 {strides = array<i32>} : memref<16x128xf32, #tpu.memory_space<vmem>>, vector<16x128xf32>,
    %c0_i32_13 = arith.constant 0 : i32
    %15 = arith.cmpi eq, %arg1, %c0_i32_13 : i32
    %16 = arith.extui %15 : i1 to i32
    %c0_i32_14 = arith.constant 0 : i32
    %17 = arith.cmpi ne, %16, %c0_i32_14 : i32
    scf.if %17 {
      %c0_15 = arith.constant 0 : index
      %c0_16 = arith.constant 0 : index
      %18 = vector.load %arg2[%c0_15, %c0_16] : memref<16x128xbf16, #tpu.memory_space<vmem>>, vector<16x128xbf16>
      %c0_17 = arith.constant 0 : index
      %c0_18 = arith.constant 0 : index
      %19 = vector.load %arg7[%c0_17, %c0_18] : memref<128x128xbf16, #tpu.memory_space<vmem>>, vector<128x128xbf16>
      %cst_19 = arith.constant dense<0.000000e+00> : vector<16x128xf32>
      %20 = tpu.matmul %18, %19, %cst_19 {dimension_numbers = #tpu.dot_dimension_numbers<[1], [0], [0], [1], [0, 0, 1, 1], [], []>} : vector<16x128xbf16>, vector<128x128xbf16>, vector<16x128xf32> -> vector<16x128xf32>
      %c0_20 = arith.constant 0 : index
      %c0_21 = arith.constant 0 : index
      %21 = vector.load %arg8[%c0_20, %c0_21] : memref<1x128xf32, #tpu.memory_space<vmem>>, vector<1x128xf32>
      %22 = vector.broadcast %21 : vector<1x128xf32> to vector<16x128xf32>
      %23 = arith.addf %20, %22 : vector<16x128xf32>
      %c0_22 = arith.constant 0 : index
      %c0_23 = arith.constant 0 : index
      %24 = vector.load %arg12[%c0_22, %c0_23] : memref<16x128xf32, #tpu.memory_space<vmem>>, vector<16x128xf32>
      %25 = arith.addf %23, %24 : vector<16x128xf32>
      %cst_24 = arith.constant dense<0.000000e+00> : vector<16xf32>
      %26 = vector.multi_reduction <add>, %25, %cst_24 [1] : vector<16x128xf32> to vector<16xf32>
      %27 = vector.shape_cast %26 : vector<16xf32> to vector<16x1xf32>
      %cst_25 = arith.constant 3.125000e-02 : f32
      %28 = vector.broadcast %cst_25 : f32 to vector<16x1xf32>
      %29 = arith.mulf %27, %28 : vector<16x1xf32>
      %30 = arith.mulf %25, %25 : vector<16x128xf32>
      %cst_26 = arith.constant dense<0.000000e+00> : vector<16xf32>
      %31 = vector.multi_reduction <add>, %30, %cst_26 [1] : vector<16x128xf32> to vector<16xf32>
      %32 = vector.shape_cast %31 : vector<16xf32> to vector<16x1xf32>
      %cst_27 = arith.constant 3.125000e-02 : f32
      %33 = vector.broadcast %cst_27 : f32 to vector<16x1xf32>
      %34 = arith.mulf %32, %33 : vector<16x1xf32>
      %35 = arith.mulf %29, %29 : vector<16x1xf32>
      %36 = arith.subf %34, %35 : vector<16x1xf32>
      %37 = vector.broadcast %29 : vector<16x1xf32> to vector<16x128xf32>
      %38 = arith.subf %25, %37 : vector<16x128xf32>
      %cst_28 = arith.constant 9.99999974E-6 : f32
      %39 = vector.broadcast %cst_28 : f32 to vector<16x1xf32>
      %40 = arith.addf %36, %39 : vector<16x1xf32>
      %41 = math.rsqrt %40 : vector<16x1xf32>
      %42 = vector.broadcast %41 : vector<16x1xf32> to vector<16x128xf32>
      %43 = arith.mulf %38, %42 : vector<16x128xf32>
      %c0_29 = arith.constant 0 : index
      %c0_30 = arith.constant 0 : index
      %44 = vector.load %arg9[%c0_29, %c0_30] : memref<1x128xf32, #tpu.memory_space<vmem>>, vector<1x128xf32>
      %45 = vector.broadcast %44 : vector<1x128xf32> to vector<16x128xf32>
      %46 = arith.mulf %43, %45 : vector<16x128xf32>
      %c0_31 = arith.constant 0 : index
      %c0_32 = arith.constant 0 : index
      %47 = vector.load %arg10[%c0_31, %c0_32] : memref<1x128xf32, #tpu.memory_space<vmem>>, vector<1x128xf32>
      %48 = vector.broadcast %47 : vector<1x128xf32> to vector<16x128xf32>
      %49 = arith.addf %46, %48 : vector<16x128xf32>
      %cst_33 = arith.constant 0.000000e+00 : f32
      %50 = vector.broadcast %cst_33 : f32 to vector<16x128xf32>
      %51 = arith.maximumf %49, %50 : vector<16x128xf32>
      %c0_34 = arith.constant 0 : index
      %c0_35 = arith.constant 0 : index
      %52 = vector.load %arg11[%c0_34, %c0_35] : memref<16x128xf32, #tpu.memory_space<vmem>>, vector<16x128xf32>
      tpu.vector_store %arg11[%c0_34, %c0_35], %51 {strides = array<i32>} : memref<16x128xf32, #tpu.memory_space<vmem>>, vector<16x128xf32>,
    } else {
    }
    return
  }
  func.func @transform_0(%arg0: i32, %arg1: i32) -> (i32, i32) {
    %c0_i32 = arith.constant 0 : i32
    %c0_i32_0 = arith.constant 0 : i32
    return %arg0, %c0_i32 : i32, i32
  }
  func.func @transform_1(%arg0: i32, %arg1: i32) -> (i32, i32) {
    %c0_i32 = arith.constant 0 : i32
    %c0_i32_0 = arith.constant 0 : i32
    return %arg1, %c0_i32 : i32, i32
  }
  func.func @transform_2(%arg0: i32, %arg1: i32) -> (i32, i32) {
    %c0_i32 = arith.constant 0 : i32
    return %arg0, %arg1 : i32, i32
  }
  func.func @transform_3(%arg0: i32, %arg1: i32) -> (i32, i32) {
    %c0_i32 = arith.constant 0 : i32
    %c0_i32_0 = arith.constant 0 : i32
    %c0_i32_1 = arith.constant 0 : i32
    return %c0_i32, %c0_i32_0 : i32, i32
  }
  func.func @transform_4(%arg0: i32, %arg1: i32) -> (i32, i32) {
    %c0_i32 = arith.constant 0 : i32
    %c0_i32_0 = arith.constant 0 : i32
    %c0_i32_1 = arith.constant 0 : i32
    return %c0_i32, %c0_i32_0 : i32, i32
  }
  func.func @transform_5(%arg0: i32, %arg1: i32) -> (i32, i32) {
    %c0_i32 = arith.constant 0 : i32
    %c0_i32_0 = arith.constant 0 : i32
    %c0_i32_1 = arith.constant 0 : i32
    return %c0_i32, %c0_i32_0 : i32, i32
  }
  func.func @transform_6(%arg0: i32, %arg1: i32) -> (i32, i32) {
    %c0_i32 = arith.constant 0 : i32
    %c0_i32_0 = arith.constant 0 : i32
    %c0_i32_1 = arith.constant 0 : i32
    return %c0_i32, %c0_i32_0 : i32, i32
  }
  func.func @transform_7(%arg0: i32, %arg1: i32) -> (i32, i32) {
    %c0_i32 = arith.constant 0 : i32
    %c0_i32_0 = arith.constant 0 : i32
    %c0_i32_1 = arith.constant 0 : i32
    return %c0_i32, %c0_i32_0 : i32, i32
  }
  func.func @transform_8(%arg0: i32, %arg1: i32) -> (i32, i32) {
    %c0_i32 = arith.constant 0 : i32
    %c0_i32_0 = arith.constant 0 : i32
    %c0_i32_1 = arith.constant 0 : i32
    return %c0_i32, %c0_i32_0 : i32, i32
  }
  func.func @transform_9(%arg0: i32, %arg1: i32) -> (i32, i32) {
    %c0_i32 = arith.constant 0 : i32
    %c0_i32_0 = arith.constant 0 : i32
    return %arg0, %c0_i32 : i32, i32
  }
}

</mosaic_0001>

<bundles_post_ra>
// kernel: gnn_forward.3
= control target key start
LH: loop header
LB: loop body
LE: loop exit
PB: predicated region body
PF: predicated region fallthrough
CT: control target
= control target key end

     0   :  { %s885_s0 = inlined_call_operand.vmem [shape: bf16[16,128], index: 0, kind: input, shape index: {}]   ;;  %s886_s1 = inlined_call_operand.vmem [shape: bf16[128,128], index: 1, kind: input, shape index: {}]   ;;  %s887_s2 = inlined_call_operand.vmem [shape: bf16[16,128], index: 2, kind: input, shape index: {}]   ;;  %s888_s3 = inlined_call_operand.vmem [shape: bf16[128,128], index: 3, kind: input, shape index: {}]   ;;  %s889_s4 = inlined_call_operand.vmem [shape: f32[1,128], index: 4, kind: input, shape index: {}]   ;;  %s890_s5 = inlined_call_operand.vmem [shape: bf16[128,128], index: 5, kind: input, shape index: {}]   ;;  %s891_s6 = inlined_call_operand.vmem [shape: f32[1,128], index: 6, kind: input, shape index: {}]   ;;  %s892_s7 = inlined_call_operand.vmem [shape: f32[1,128], index: 7, kind: input, shape index: {}]   ;;  %s893_s8 = inlined_call_operand.vmem [shape: f32[1,128], index: 8, kind: input, shape index: {}]   ;;  %s894_s9 = inlined_call_operand.hbm [shape: f32[16,128], index: 9, kind: output, shape index: {}]  }
   0x1   :  { %v667_v0 = vld [vmem:[%s888_s3 + $0x38] sm:$0xff]   ;;  %v668_v1 = vld [vmem:[%s888_s3 + $0x30] sm:$0xff]   ;;  %v669_v2 = vld [vmem:[%s888_s3 + $0x28] sm:$0xff]  }
   0x2   :  { %590 = vmatprep.subr.bf16.mxu0 %v667_v0  ;;  %v670_v3 = vld [vmem:[%s888_s3 + $0x20] sm:$0xff]   ;;  %v671_v5 = vld [vmem:[%s888_s3 + $0x18] sm:$0xff]   ;;  %v672_v6 = vld [vmem:[%s888_s3 + $0x10] sm:$0xff]  }
   0x3   :  { %591 = vmatpush3.bf16.msra.mxu0 %v667_v0  ;;  %v675_v4 = vld [vmem:[%s886_s1] sm:$0xff]   ;;  %v673_v7 = vld [vmem:[%s888_s3 + $0x8] sm:$0xff]  }
   0x4   :  { %592 = vmatprep.subr.bf16.mxu0 %v668_v1  ;;  %606 = vmatprep.mubr.bf16.mxu0 %v675_v4 }
   0x7   :  { %593 = vmatpush3.bf16.msra.mxu0 %v668_v1 }
   0x8   :  { %594 = vmatprep.subr.bf16.mxu0 %v669_v2 }
   0xb   :  { %595 = vmatpush3.bf16.msra.mxu0 %v669_v2 }
   0xc   :  { %596 = vmatprep.subr.bf16.mxu0 %v670_v3 }
   0xf   :  { %597 = vmatpush3.bf16.msra.mxu0 %v670_v3 }
  0x10   :  { %598 = vmatprep.subr.bf16.mxu0 %v671_v5 }
  0x13   :  { %599 = vmatpush3.bf16.msra.mxu0 %v671_v5 }
  0x14   :  { %600 = vmatprep.subr.bf16.mxu0 %v672_v6 }
  0x15   :  { %14 = vsyncpa [#allocation4], 0  ;;  %v674_v8 = vld [vmem:[%s888_s3] sm:$0xff]   ;;  %v676_v9 = vld [vmem:[%s886_s1 + $0x8] sm:$0xff]   ;;  %v719_v17 = vmov 0.0   ;;  %vm720_vm0 = vmmov 0  }
  0x16   :  { %v677_v10 = vld [vmem:[%s886_s1 + $0x10] sm:$0xff]   ;;  %v678_v11 = vld [vmem:[%s886_s1 + $0x18] sm:$0xff]   ;;  %v679_v12 = vld [vmem:[%s886_s1 + $0x20] sm:$0xff]   ;;  %622 = vmatprep.subr.bf16.mxu1 %v719_v17  ;;  %638 = vmatprep.mubr.msk.bf16.mxu1 %vm720_vm0, %v719_v17  ;;  %s721_s19 = smov [#allocation3]  }
  0x17   :  { %601 = vmatpush3.bf16.msra.mxu0 %v672_v6  ;;  %v680_v13 = vld [vmem:[%s886_s1 + $0x28] sm:$0xff]   ;;  %v681_v14 = vld [vmem:[%s886_s1 + $0x30] sm:$0xff]   ;;  %v682_v15 = vld [vmem:[%s886_s1 + $0x38] sm:$0xff]   ;;  %s515_s20 = sshll.u32 %s721_s19, 4  ;;  %s516_s20 = int_to_ptr.vmem [resolvable:$true] %s515_s20 }
  0x18   :  { %602 = vmatprep.subr.bf16.mxu0 %v673_v7  ;;  %v683_v16 = vld [vmem:[%s890_s5 + $0x38] sm:$0xff]   ;;  %v684_v18 = vld [vmem:[%s890_s5 + $0x30] sm:$0xff]   ;;  %v685_v19 = vld [vmem:[%s890_s5 + $0x28] sm:$0xff]   ;;  %p702_p1 = scmp.lt.s32.totalorder %s516_s20, %s516_s20 }
  0x19   :  { %v686_v20 = vld [vmem:[%s890_s5 + $0x20] sm:$0xff]   ;;  %v687_v21 = vld [vmem:[%s890_s5 + $0x18] sm:$0xff]   ;;  %v688_v22 = vld [vmem:[%s890_s5 + $0x10] sm:$0xff]  }
  0x1a   :  { %v689_v23 = vld [vmem:[%s890_s5 + $0x8] sm:$0xff]   ;;  %v690_v24 = vld [vmem:[%s890_s5] sm:$0xff]  }
  0x1b   :  { %603 = vmatpush3.bf16.msra.mxu0 %v673_v7  ;;  %v691_v25 = vld [vmem:[%s885_s0] sm:$0xff]  }
  0x1c   :  { %604 = vmatprep.subr.bf16.mxu0 %v674_v8  ;;  %v526_v40 = vld [vmem:[%s889_s4] ss:$0 sm:$0xff] }
  0x1d   :  { %v692_v3 = vld [vmem:[%s887_s2] sm:$0xff]  }
  0x1f   :  { %605 = vmatpush3.bf16.msra.mxu0 %v674_v8  ;;  %v544_v8 = vld [vmem:[%s891_s6] ss:$0 sm:$0xff] }
  0x20   :  { %642 = vmatprep.subr.bf16.mxu0 %v719_v17 }
  0x22   :  { %607 = vmatmul.mubr.bf16.vlgmr.msra.gmra.mxu0 %v676_v9 }
  0x23   :  { %610 = vmatprep.mubr.bf16.mxu0 %v677_v10  ;;  %643 = vmatpush3.bf16.msra.mxu0 %v683_v16 }
  0x24   :  { %644 = vmatprep.subr.bf16.mxu0 %v719_v17 }
  0x27   :  { %645 = vmatpush3.bf16.msra.mxu0 %v684_v18 }
  0x28   :  { %646 = vmatprep.subr.bf16.mxu0 %v719_v17 }
  0x2a   :  { %611 = vmatmul.mubr.bf16.gmra.mxu0 %v678_v11 }
  0x2b   :  { %614 = vmatprep.mubr.bf16.mxu0 %v679_v12  ;;  %647 = vmatpush3.bf16.msra.mxu0 %v685_v19 }
  0x2c   :  { %648 = vmatprep.subr.bf16.mxu0 %v719_v17 }
  0x2f   :  { %649 = vmatpush3.bf16.msra.mxu0 %v686_v20 }
  0x30   :  { %650 = vmatprep.subr.bf16.mxu0 %v719_v17 }
  0x32   :  { %615 = vmatmul.mubr.bf16.gmra.mxu0 %v680_v13 }
  0x33   :  { %618 = vmatprep.mubr.bf16.mxu0 %v681_v14  ;;  %651 = vmatpush3.bf16.msra.mxu0 %v687_v21 }
  0x34   :  { %652 = vmatprep.subr.bf16.mxu0 %v719_v17 }
  0x37   :  { %653 = vmatpush3.bf16.msra.mxu0 %v688_v22 }
  0x38   :  { %654 = vmatprep.subr.bf16.mxu0 %v719_v17 }
  0x3a   :  { %619 = vmatmul.mubr.bf16.gmra.mxu0 %v682_v15 }
  0x3b   :  { %655 = vmatpush3.bf16.msra.mxu0 %v689_v23  ;;  %658 = vmatprep.mubr.msk.bf16.mxu0 %vm720_vm0, %v719_v17 }
  0x3c   :  { %656 = vmatprep.subr.bf16.mxu0 %v719_v17 }
  0x3f   :  { %657 = vmatpush3.bf16.msra.mxu0 %v690_v24 }
  0x42   :  { %659 = vmatmul.mubr.bf16.vlgmr.msra.gmra.mxu0 %v691_v25 }
  0xe2   :  { %v608_v26 = vpop.f32.mrf.mxu0 }
  0xe3   :  { %v218_v62 = vadd.f32 %v608_v26, %v526_v40 }
  0xe4   :  { %v209_v27 = vpop.f32.mrf.mxu0 }
  0xe5   :  { %v210_v1 = vadd.f32 %v526_v40, %v209_v27 }
  0xe6   :  { %v609_v28 = vpop.f32.mrf.mxu0 }
  0xe7   :  { %v221_v60 = vadd.f32 %v609_v28, %v526_v40 }
  0xe8   :  { %v212_v29 = vpop.f32.mrf.mxu0 }
  0xe9   :  { %v277_v63 = vpack.c.bf16 %v221_v60, %v218_v62  ;;  %v213_v0 = vadd.f32 %v526_v40, %v212_v29 }
  0xea   :  { %v612_v30 = vpop.f32.mrf.mxu0 }
  0xeb   :  { %v234_v56 = vadd.f32 %v612_v30, %v526_v40  ;;  %v276_v2 = vpack.c.bf16 %v213_v0, %v210_v1 }
  0xec   :  { %v225_v31 = vpop.f32.mrf.mxu0 }
  0xed   :  { %v226_v59 = vadd.f32 %v526_v40, %v225_v31 }
  0xee   :  { %v613_v32 = vpop.f32.mrf.mxu0 }
  0xef   :  { %v237_v54 = vadd.f32 %v613_v32, %v526_v40 }
  0xf0   :  { %v228_v33 = vpop.f32.mrf.mxu0 }
  0xf1   :  { %v279_v57 = vpack.c.bf16 %v237_v54, %v234_v56  ;;  %v229_v58 = vadd.f32 %v526_v40, %v228_v33 }
  0xf2   :  { %v616_v34 = vpop.f32.mrf.mxu0 }
  0xf3   :  { %v250_v50 = vadd.f32 %v616_v34, %v526_v40  ;;  %v278_v61 = vpack.c.bf16 %v229_v58, %v226_v59 }
  0xf4   :  { %v241_v35 = vpop.f32.mrf.mxu0 }
  0xf5   :  { %v242_v53 = vadd.f32 %v526_v40, %v241_v35  ;;  %v554_v35 = vld [vmem:[%s892_s7] ss:$0 sm:$0xff]  ;;  %s697_s7 = scalar_lea.vmem %s516_s20, 256 }
  0xf6   :  { %v617_v36 = vpop.f32.mrf.mxu0  ;;  %p698_p0 = scmp.ne.s32.totalorder %s516_s20, %s697_s7  ;;  %p703_p2 = scmp.lt.s32.totalorder %s697_s7, %s697_s7 }
  0xf7   :  { %v253_v48 = vadd.f32 %v617_v36, %v526_v40 }
  0xf8   :  { %v244_v37 = vpop.f32.mrf.mxu0  ;;  %p704_p3 = por %p703_p2, %p702_p1 }
  0xf9   :  { %v281_v51 = vpack.c.bf16 %v253_v48, %v250_v50  ;;  %v245_v52 = vadd.f32 %v526_v40, %v244_v37  ;;  %v555_v37 = vld [vmem:[%s893_s8] ss:$0 sm:$0xff] }
  0xfa   :  { %v620_v38 = vpop.f32.mrf.mxu0  ;;  %p705_p4 = pnand %p704_p3, %p698_p0 }
  0xfb   :  { %v266_v42 = vadd.f32 %v620_v38, %v526_v40  ;;  %v280_v55 = vpack.c.bf16 %v245_v52, %v242_v53 }
  0xfc   :  { %v257_v39 = vpop.f32.mrf.mxu0 }
  0xfd   :  { %v258_v47 = vadd.f32 %v526_v40, %v257_v39 }
  0xfe   :  { %v621_v41 = vpop.f32.mrf.mxu0 }
  0xff   :  { %v269_v43 = vadd.f32 %v621_v41, %v526_v40 }
 0x100   :  { %v260_v44 = vpop.f32.mrf.mxu0 }
 0x101   :  { %v261_v45 = vadd.f32 %v526_v40, %v260_v44  ;;  %v283_v46 = vpack.c.bf16 %v269_v43, %v266_v42 }
 0x102   :  { %v451_v4 = vpop.f32.mrf.mxu0 }
 0x103   :  { %623 = vmatpush3.bf16.msra.mxu1 %v283_v46  ;;  %v282_v49 = vpack.c.bf16 %v261_v45, %v258_v47  ;;  %v452_v9 = vadd.f32 %v544_v8, %v451_v4 }
 0x104   :  { %624 = vmatprep.subr.bf16.mxu1 %v719_v17  ;;  %v660_v5 = vpop.f32.mrf.mxu0 }
 0x106   :  { %v454_v6 = vpop.f32.mrf.mxu0 }
 0x107   :  { %625 = vmatpush3.bf16.msra.mxu1 %v282_v49  ;;  %v455_v13 = vadd.f32 %v544_v8, %v454_v6 }
 0x108   :  { %626 = vmatprep.subr.bf16.mxu1 %v719_v17  ;;  %v661_v7 = vpop.f32.mrf.mxu0 }
 0x10b   :  { %627 = vmatpush3.bf16.msra.mxu1 %v281_v51 }
 0x10c   :  { %628 = vmatprep.subr.bf16.mxu1 %v719_v17 }
 0x10f   :  { %629 = vmatpush3.bf16.msra.mxu1 %v280_v55 }
 0x110   :  { %630 = vmatprep.subr.bf16.mxu1 %v719_v17 }
 0x113   :  { %631 = vmatpush3.bf16.msra.mxu1 %v279_v57 }
 0x114   :  { %632 = vmatprep.subr.bf16.mxu1 %v719_v17 }
 0x117   :  { %633 = vmatpush3.bf16.msra.mxu1 %v278_v61 }
 0x118   :  { %634 = vmatprep.subr.bf16.mxu1 %v719_v17 }
 0x11b   :  { %635 = vmatpush3.bf16.msra.mxu1 %v277_v63 }
 0x11c   :  { %636 = vmatprep.subr.bf16.mxu1 %v719_v17 }
 0x11f   :  { %637 = vmatpush3.bf16.msra.mxu1 %v276_v2 }
 0x122   :  { %639 = vmatmul.mubr.bf16.vlgmr.msra.gmra.mxu1 %v692_v3 }
 0x1e2   :  { %v324_v10 = vpop.f32.mrf.mxu1 }
 0x1e3   :  { %v460_v11 = vadd.f32 %v452_v9, %v324_v10 }
 0x1e4   :  { %v640_v12 = vpop.f32.mrf.mxu1 }
 0x1e5   :  { %462 = vadd.xlane.f32.xlu0 %v460_v11  ;;  %v468_v14 = vmul.f32 %v460_v11, %v460_v11 }
 0x1e6   :  { %v327_v15 = vpop.f32.mrf.mxu1 }
 0x1e7   :  { %v461_v16 = vadd.f32 %v455_v13, %v327_v15  ;;  %470 = vadd.xlane.f32.xlu1 %v468_v14 }
 0x1e8   :  { %v641_v17 = vpop.f32.mrf.mxu1 }
 0x1e9   :  { %464 = vadd.xlane.f32.xlu0 %v461_v16  ;;  %v469_v18 = vmul.f32 %v461_v16, %v461_v16 }
 0x1eb   :  { %472 = vadd.xlane.f32.xlu1 %v469_v18 }
 0x26e   :  { %v463_v19 = vpop.xlane.xlu0 %462 }
 0x26f   :  { %v466_v20 = vmul.f32 0.03125, %v463_v19 }
 0x270   :  { %v471_v21 = vpop.xlane.xlu1 %470 }
 0x271   :  { %v476_v22 = vmul.f32 %v466_v20, %v466_v20  ;;  %v474_v23 = vmul.f32 0.03125, %v471_v21  ;;  %v480_v33 = vsub.f32 %v460_v11, %v466_v20 }
 0x272   :  { %v465_v24 = vpop.xlane.xlu0 %464 }
 0x273   :  { %v478_v25 = vsub.f32 %v474_v23, %v476_v22  ;;  %v467_v26 = vmul.f32 0.03125, %v465_v24 }
 0x274   :  { %v473_v27 = vpop.xlane.xlu1 %472 }
 0x275   :  { %v482_v28 = vadd.f32 1e-05, %v478_v25  ;;  %v477_v29 = vmul.f32 %v467_v26, %v467_v26  ;;  %v475_v30 = vmul.f32 0.03125, %v473_v27  ;;  %v481_v38 = vsub.f32 %v461_v16, %v467_v26 }
 0x277   :  { %693 = vrsqrt.f32 %v482_v28  ;;  %v479_v31 = vsub.f32 %v475_v30, %v477_v29 }
 0x279   :  { %v483_v32 = vadd.f32 1e-05, %v479_v31 }
 0x27b   :  { %695 = vrsqrt.f32 %v483_v32 }
 0x284   :  { %v694_v34 = vpop.eup %693 }
 0x285   :  { %v486_v36 = vmul.f32 %v694_v34, %v480_v33 }
 0x287   :  { %v495_v39 = vmul.f32 %v554_v35, %v486_v36 }
 0x288   :  { %v696_v40 = vpop.eup %695 }
 0x289   :  { %v487_v41 = vmul.f32 %v696_v40, %v481_v38  ;;  %v504_v42 = vadd.f32 %v555_v37, %v495_v39 }
 0x28b   :  { %v496_v43 = vmul.f32 %v554_v35, %v487_v41  ;;  %v506_v44 = vmax.f32 %v504_v42, 0.0 }
 0x28d   :  { %v505_v45 = vadd.f32 %v555_v37, %v496_v43  ;;  %508 = vst [vmem:[#allocation3] sm:$0xff] %v506_v44 }
 0x28f   :  { %v507_v46 = vmax.f32 %v505_v45, 0.0 }
 0x291   :  { %509 = vst [vmem:[#allocation3 + $0x8] sm:$0xff] %v507_v46 }
 0x292   :  { %708 = shalt.err (!%p705_p4)
}
 0x293   :  { %s722_s8 = smov 128   ;;  %s723_s21 = smov 8  }
 0x294   :  { %521 = dma.vmem_to_hbm [thread:$0]  %s516_s20, 256, %s894_s9, [#allocation4], %s722_s8, %s722_s8, %s723_s21  }
 0x295   :  { %717 = dma.done.wait [#allocation4], 256  }
 0x296   :  { %718 = vsyncadd [#allocation4], 4294967040 }
 0x297   :  { %525 = vsyncpa [#allocation4], 1 }

// kernel: gnn_forward.2
= control target key start
LH: loop header
LB: loop body
LE: loop exit
PB: predicated region body
PF: predicated region fallthrough
CT: control target
= control target key end

     0   :  { %v681_v17 = vmov 0.0   ;;  %vm682_vm0 = vmmov 0   ;;  %s847_s3 = inlined_call_operand.vmem [shape: bf16[128,128], index: 3, kind: input, shape index: {}]   ;;  %s848_s1 = inlined_call_operand.vmem [shape: bf16[128,128], index: 1, kind: input, shape index: {}]   ;;  %s849_s5 = inlined_call_operand.vmem [shape: bf16[128,128], index: 5, kind: input, shape index: {}]   ;;  %s850_s0 = inlined_call_operand.vmem [shape: bf16[16,128], index: 0, kind: input, shape index: {}]   ;;  %s851_s2 = inlined_call_operand.vmem [shape: bf16[16,128], index: 2, kind: input, shape index: {}]   ;;  %s852_s4 = inlined_call_operand.vmem [shape: f32[1,128], index: 4, kind: input, shape index: {}]   ;;  %s853_s6 = inlined_call_operand.vmem [shape: f32[1,128], index: 6, kind: input, shape index: {}]   ;;  %s854_s7 = inlined_call_operand.vmem [shape: f32[1,128], index: 7, kind: input, shape index: {}]   ;;  %s855_s8 = inlined_call_operand.vmem [shape: f32[1,128], index: 8, kind: input, shape index: {}]   ;;  %s856_s9 = inlined_call_operand.vmem [shape: f32[16,128], index: 9, kind: output, shape index: {}]  }
   0x1   :  { %v651_v0 = vld [vmem:[%s847_s3 + $0x38] sm:$0xff]   ;;  %v652_v1 = vld [vmem:[%s847_s3 + $0x30] sm:$0xff]   ;;  %v653_v2 = vld [vmem:[%s847_s3 + $0x28] sm:$0xff]   ;;  %609 = vmatprep.subr.bf16.mxu1 %v681_v17  ;;  %625 = vmatprep.mubr.msk.bf16.mxu1 %vm682_vm0, %v681_v17 }
   0x2   :  { %577 = vmatprep.subr.bf16.mxu0 %v651_v0  ;;  %v654_v3 = vld [vmem:[%s847_s3 + $0x20] sm:$0xff]   ;;  %v655_v5 = vld [vmem:[%s847_s3 + $0x18] sm:$0xff]   ;;  %v656_v6 = vld [vmem:[%s847_s3 + $0x10] sm:$0xff]  }
   0x3   :  { %578 = vmatpush3.bf16.msra.mxu0 %v651_v0  ;;  %v659_v4 = vld [vmem:[%s848_s1] sm:$0xff]   ;;  %v657_v7 = vld [vmem:[%s847_s3 + $0x8] sm:$0xff]   ;;  %v661_v10 = vld [vmem:[%s848_s1 + $0x10] sm:$0xff]  }
   0x4   :  { %579 = vmatprep.subr.bf16.mxu0 %v652_v1  ;;  %593 = vmatprep.mubr.bf16.mxu0 %v659_v4  ;;  %v658_v8 = vld [vmem:[%s847_s3] sm:$0xff]   ;;  %v660_v9 = vld [vmem:[%s848_s1 + $0x8] sm:$0xff]   ;;  %v662_v11 = vld [vmem:[%s848_s1 + $0x18] sm:$0xff]  }
   0x5   :  { %v663_v12 = vld [vmem:[%s848_s1 + $0x20] sm:$0xff]   ;;  %v664_v13 = vld [vmem:[%s848_s1 + $0x28] sm:$0xff]   ;;  %v665_v14 = vld [vmem:[%s848_s1 + $0x30] sm:$0xff]  }
   0x6   :  { %v666_v15 = vld [vmem:[%s848_s1 + $0x38] sm:$0xff]   ;;  %v668_v18 = vld [vmem:[%s849_s5 + $0x30] sm:$0xff]   ;;  %v669_v19 = vld [vmem:[%s849_s5 + $0x28] sm:$0xff]  }
   0x7   :  { %580 = vmatpush3.bf16.msra.mxu0 %v652_v1  ;;  %v667_v16 = vld [vmem:[%s849_s5 + $0x38] sm:$0xff]   ;;  %v670_v20 = vld [vmem:[%s849_s5 + $0x20] sm:$0xff]   ;;  %v672_v22 = vld [vmem:[%s849_s5 + $0x10] sm:$0xff]  }
   0x8   :  { %581 = vmatprep.subr.bf16.mxu0 %v653_v2  ;;  %v671_v21 = vld [vmem:[%s849_s5 + $0x18] sm:$0xff]   ;;  %v673_v23 = vld [vmem:[%s849_s5 + $0x8] sm:$0xff]   ;;  %v674_v24 = vld [vmem:[%s849_s5] sm:$0xff]  }
   0x9   :  { %v675_v25 = vld [vmem:[%s850_s0] sm:$0xff]  }
   0xa   :  { %v513_v40 = vld [vmem:[%s852_s4] ss:$0 sm:$0xff] }
   0xb   :  { %582 = vmatpush3.bf16.msra.mxu0 %v653_v2 }
   0xc   :  { %583 = vmatprep.subr.bf16.mxu0 %v654_v3 }
   0xf   :  { %584 = vmatpush3.bf16.msra.mxu0 %v654_v3  ;;  %v676_v3 = vld [vmem:[%s851_s2] sm:$0xff]  }
  0x10   :  { %585 = vmatprep.subr.bf16.mxu0 %v655_v5 }
  0x13   :  { %586 = vmatpush3.bf16.msra.mxu0 %v655_v5 }
  0x14   :  { %587 = vmatprep.subr.bf16.mxu0 %v656_v6 }
  0x17   :  { %588 = vmatpush3.bf16.msra.mxu0 %v656_v6 }
  0x18   :  { %589 = vmatprep.subr.bf16.mxu0 %v657_v7 }
  0x1b   :  { %590 = vmatpush3.bf16.msra.mxu0 %v657_v7 }
  0x1c   :  { %591 = vmatprep.subr.bf16.mxu0 %v658_v8 }
  0x1f   :  { %592 = vmatpush3.bf16.msra.mxu0 %v658_v8  ;;  %v531_v8 = vld [vmem:[%s853_s6] ss:$0 sm:$0xff] }
  0x20   :  { %629 = vmatprep.subr.bf16.mxu0 %v681_v17 }
  0x22   :  { %594 = vmatmul.mubr.bf16.vlgmr.msra.gmra.mxu0 %v660_v9 }
  0x23   :  { %597 = vmatprep.mubr.bf16.mxu0 %v661_v10  ;;  %630 = vmatpush3.bf16.msra.mxu0 %v667_v16 }
  0x24   :  { %631 = vmatprep.subr.bf16.mxu0 %v681_v17 }
  0x27   :  { %632 = vmatpush3.bf16.msra.mxu0 %v668_v18 }
  0x28   :  { %633 = vmatprep.subr.bf16.mxu0 %v681_v17 }
  0x2a   :  { %598 = vmatmul.mubr.bf16.gmra.mxu0 %v662_v11 }
  0x2b   :  { %601 = vmatprep.mubr.bf16.mxu0 %v663_v12  ;;  %634 = vmatpush3.bf16.msra.mxu0 %v669_v19 }
  0x2c   :  { %635 = vmatprep.subr.bf16.mxu0 %v681_v17 }
  0x2f   :  { %636 = vmatpush3.bf16.msra.mxu0 %v670_v20 }
  0x30   :  { %637 = vmatprep.subr.bf16.mxu0 %v681_v17 }
  0x32   :  { %602 = vmatmul.mubr.bf16.gmra.mxu0 %v664_v13 }
  0x33   :  { %605 = vmatprep.mubr.bf16.mxu0 %v665_v14  ;;  %638 = vmatpush3.bf16.msra.mxu0 %v671_v21 }
  0x34   :  { %639 = vmatprep.subr.bf16.mxu0 %v681_v17 }
  0x37   :  { %640 = vmatpush3.bf16.msra.mxu0 %v672_v22 }
  0x38   :  { %641 = vmatprep.subr.bf16.mxu0 %v681_v17 }
  0x3a   :  { %606 = vmatmul.mubr.bf16.gmra.mxu0 %v666_v15 }
  0x3b   :  { %642 = vmatpush3.bf16.msra.mxu0 %v673_v23  ;;  %645 = vmatprep.mubr.msk.bf16.mxu0 %vm682_vm0, %v681_v17 }
  0x3c   :  { %643 = vmatprep.subr.bf16.mxu0 %v681_v17 }
  0x3f   :  { %644 = vmatpush3.bf16.msra.mxu0 %v674_v24 }
  0x42   :  { %646 = vmatmul.mubr.bf16.vlgmr.msra.gmra.mxu0 %v675_v25 }
  0xe2   :  { %v595_v26 = vpop.f32.mrf.mxu0 }
  0xe3   :  { %v217_v62 = vadd.f32 %v595_v26, %v513_v40 }
  0xe4   :  { %v208_v27 = vpop.f32.mrf.mxu0 }
  0xe5   :  { %v209_v1 = vadd.f32 %v513_v40, %v208_v27 }
  0xe6   :  { %v596_v28 = vpop.f32.mrf.mxu0 }
  0xe7   :  { %v220_v60 = vadd.f32 %v596_v28, %v513_v40 }
  0xe8   :  { %v211_v29 = vpop.f32.mrf.mxu0 }
  0xe9   :  { %v276_v63 = vpack.c.bf16 %v220_v60, %v217_v62  ;;  %v212_v0 = vadd.f32 %v513_v40, %v211_v29 }
  0xea   :  { %v599_v30 = vpop.f32.mrf.mxu0 }
  0xeb   :  { %v233_v56 = vadd.f32 %v599_v30, %v513_v40  ;;  %v275_v2 = vpack.c.bf16 %v212_v0, %v209_v1 }
  0xec   :  { %v224_v31 = vpop.f32.mrf.mxu0 }
  0xed   :  { %v225_v59 = vadd.f32 %v513_v40, %v224_v31 }
  0xee   :  { %v600_v32 = vpop.f32.mrf.mxu0 }
  0xef   :  { %v236_v54 = vadd.f32 %v600_v32, %v513_v40 }
  0xf0   :  { %v227_v33 = vpop.f32.mrf.mxu0 }
  0xf1   :  { %v278_v57 = vpack.c.bf16 %v236_v54, %v233_v56  ;;  %v228_v58 = vadd.f32 %v513_v40, %v227_v33 }
  0xf2   :  { %v603_v34 = vpop.f32.mrf.mxu0 }
  0xf3   :  { %v249_v50 = vadd.f32 %v603_v34, %v513_v40  ;;  %v277_v61 = vpack.c.bf16 %v228_v58, %v225_v59 }
  0xf4   :  { %v240_v35 = vpop.f32.mrf.mxu0 }
  0xf5   :  { %v241_v53 = vadd.f32 %v513_v40, %v240_v35  ;;  %v541_v35 = vld [vmem:[%s854_s7] ss:$0 sm:$0xff] }
  0xf6   :  { %v604_v36 = vpop.f32.mrf.mxu0 }
  0xf7   :  { %v252_v48 = vadd.f32 %v604_v36, %v513_v40 }
  0xf8   :  { %v243_v37 = vpop.f32.mrf.mxu0 }
  0xf9   :  { %v280_v51 = vpack.c.bf16 %v252_v48, %v249_v50  ;;  %v244_v52 = vadd.f32 %v513_v40, %v243_v37  ;;  %v542_v37 = vld [vmem:[%s855_s8] ss:$0 sm:$0xff] }
  0xfa   :  { %v607_v38 = vpop.f32.mrf.mxu0 }
  0xfb   :  { %v265_v42 = vadd.f32 %v607_v38, %v513_v40  ;;  %v279_v55 = vpack.c.bf16 %v244_v52, %v241_v53 }
  0xfc   :  { %v256_v39 = vpop.f32.mrf.mxu0 }
  0xfd   :  { %v257_v47 = vadd.f32 %v513_v40, %v256_v39 }
  0xfe   :  { %v608_v41 = vpop.f32.mrf.mxu0 }
  0xff   :  { %v268_v43 = vadd.f32 %v608_v41, %v513_v40 }
 0x100   :  { %v259_v44 = vpop.f32.mrf.mxu0 }
 0x101   :  { %v260_v45 = vadd.f32 %v513_v40, %v259_v44  ;;  %v282_v46 = vpack.c.bf16 %v268_v43, %v265_v42 }
 0x102   :  { %v450_v4 = vpop.f32.mrf.mxu0 }
 0x103   :  { %610 = vmatpush3.bf16.msra.mxu1 %v282_v46  ;;  %v281_v49 = vpack.c.bf16 %v260_v45, %v257_v47  ;;  %v451_v9 = vadd.f32 %v531_v8, %v450_v4 }
 0x104   :  { %611 = vmatprep.subr.bf16.mxu1 %v681_v17  ;;  %v647_v5 = vpop.f32.mrf.mxu0 }
 0x106   :  { %v453_v6 = vpop.f32.mrf.mxu0 }
 0x107   :  { %612 = vmatpush3.bf16.msra.mxu1 %v281_v49  ;;  %v454_v13 = vadd.f32 %v531_v8, %v453_v6 }
 0x108   :  { %613 = vmatprep.subr.bf16.mxu1 %v681_v17  ;;  %v648_v7 = vpop.f32.mrf.mxu0 }
 0x10b   :  { %614 = vmatpush3.bf16.msra.mxu1 %v280_v51 }
 0x10c   :  { %615 = vmatprep.subr.bf16.mxu1 %v681_v17 }
 0x10f   :  { %616 = vmatpush3.bf16.msra.mxu1 %v279_v55 }
 0x110   :  { %617 = vmatprep.subr.bf16.mxu1 %v681_v17 }
 0x113   :  { %618 = vmatpush3.bf16.msra.mxu1 %v278_v57 }
 0x114   :  { %619 = vmatprep.subr.bf16.mxu1 %v681_v17 }
 0x117   :  { %620 = vmatpush3.bf16.msra.mxu1 %v277_v61 }
 0x118   :  { %621 = vmatprep.subr.bf16.mxu1 %v681_v17 }
 0x11b   :  { %622 = vmatpush3.bf16.msra.mxu1 %v276_v63 }
 0x11c   :  { %623 = vmatprep.subr.bf16.mxu1 %v681_v17 }
 0x11f   :  { %624 = vmatpush3.bf16.msra.mxu1 %v275_v2 }
 0x122   :  { %626 = vmatmul.mubr.bf16.vlgmr.msra.gmra.mxu1 %v676_v3 }
 0x1e2   :  { %v323_v10 = vpop.f32.mrf.mxu1 }
 0x1e3   :  { %v459_v11 = vadd.f32 %v451_v9, %v323_v10 }
 0x1e4   :  { %v627_v12 = vpop.f32.mrf.mxu1 }
 0x1e5   :  { %461 = vadd.xlane.f32.xlu0 %v459_v11  ;;  %v467_v14 = vmul.f32 %v459_v11, %v459_v11 }
 0x1e6   :  { %v326_v15 = vpop.f32.mrf.mxu1 }
 0x1e7   :  { %v460_v16 = vadd.f32 %v454_v13, %v326_v15  ;;  %469 = vadd.xlane.f32.xlu1 %v467_v14 }
 0x1e8   :  { %v628_v17 = vpop.f32.mrf.mxu1 }
 0x1e9   :  { %463 = vadd.xlane.f32.xlu0 %v460_v16  ;;  %v468_v18 = vmul.f32 %v460_v16, %v460_v16 }
 0x1eb   :  { %471 = vadd.xlane.f32.xlu1 %v468_v18 }
 0x26e   :  { %v462_v19 = vpop.xlane.xlu0 %461 }
 0x26f   :  { %v465_v20 = vmul.f32 0.03125, %v462_v19 }
 0x270   :  { %v470_v21 = vpop.xlane.xlu1 %469 }
 0x271   :  { %v475_v22 = vmul.f32 %v465_v20, %v465_v20  ;;  %v473_v23 = vmul.f32 0.03125, %v470_v21  ;;  %v479_v33 = vsub.f32 %v459_v11, %v465_v20 }
 0x272   :  { %v464_v24 = vpop.xlane.xlu0 %463 }
 0x273   :  { %v477_v25 = vsub.f32 %v473_v23, %v475_v22  ;;  %v466_v26 = vmul.f32 0.03125, %v464_v24 }
 0x274   :  { %v472_v27 = vpop.xlane.xlu1 %471 }
 0x275   :  { %v481_v28 = vadd.f32 1e-05, %v477_v25  ;;  %v476_v29 = vmul.f32 %v466_v26, %v466_v26  ;;  %v474_v30 = vmul.f32 0.03125, %v472_v27  ;;  %v480_v39 = vsub.f32 %v460_v16, %v466_v26 }
 0x277   :  { %677 = vrsqrt.f32 %v481_v28  ;;  %v478_v31 = vsub.f32 %v474_v30, %v476_v29 }
 0x279   :  { %v482_v32 = vadd.f32 1e-05, %v478_v31 }
 0x27b   :  { %679 = vrsqrt.f32 %v482_v32 }
 0x284   :  { %v678_v34 = vpop.eup %677 }
 0x285   :  { %v485_v36 = vmul.f32 %v678_v34, %v479_v33 }
 0x287   :  { %v494_v38 = vmul.f32 %v541_v35, %v485_v36 }
 0x288   :  { %v680_v40 = vpop.eup %679 }
 0x289   :  { %v503_v41 = vadd.f32 %v542_v37, %v494_v38  ;;  %v486_v42 = vmul.f32 %v680_v40, %v480_v39 }
 0x28b   :  { %v505_v43 = vmax.f32 %v503_v41, 0.0  ;;  %v495_v44 = vmul.f32 %v541_v35, %v486_v42 }
 0x28d   :  { %507 = vst [vmem:[%s856_s9] sm:$0xff] %v505_v43  ;;  %v504_v45 = vadd.f32 %v542_v37, %v495_v44 }
 0x28f   :  { %v506_v46 = vmax.f32 %v504_v45, 0.0 }
 0x291   :  { %508 = vst [vmem:[%s856_s9 + $0x8] sm:$0xff] %v506_v46 }

</bundles_post_ra>
